<compile_context>
chip_gen: v7x
topology: tpu7x:2x2x1
jax: 0.10.0
libtpu: 0.0.40
codegen_flags: <defaults>
</compile_context>

<pallas_src>
import math
from functools import lru_cache

import jax
import jax.numpy as jnp
from jax.experimental import pallas as pl
from jax.experimental.pallas import tpu as pltpu


# ----------------------------------------------------------------------------
# Kernel: one lane-dense matmul per row tile.
# ----------------------------------------------------------------------------
def _interp_matmul_kernel(x_ref, m_ref, o_ref):
    # (tr, Kb) @ (Kb, Nb) on the MXU, f32 accumulation.  x is cast to f32 in
    # vregs (no-op for f32 inputs; keeps weights full precision for bf16 x).
    o_ref[...] = jnp.dot(
        x_ref[...].astype(jnp.float32),
        m_ref[...],
        preferred_element_type=jnp.float32,
    ).astype(o_ref.dtype)


# ----------------------------------------------------------------------------
# Parameter setup (cached, never on the hot path).
# ----------------------------------------------------------------------------
@lru_cache(maxsize=None)
def _build_interp_matrix(w, n_fill):
    """Real (W, W+n_fill) matrix M so that the 1-D pipeline
       ifft(ifftshift(pad(fftshift(fft(x))))).real  ==  x @ M  (exact)."""
    # TODO(synk): the complex FFT itself has no Pallas primitive; it is folded
    # exactly into this deterministic matrix (not an approximation).
    drop = n_fill // 2
    eye = jnp.eye(w, dtype=jnp.float32)
    X = jnp.fft.fft(eye, axis=-1)
    Xs = jnp.fft.fftshift(X, axes=-1)
    Xp = jnp.pad(Xs, ((0, 0), (drop, drop)))
    Xu = jnp.fft.ifftshift(Xp, axes=-1)
    M = jnp.real(jnp.fft.ifft(Xu, axis=-1)).astype(jnp.float32)
    return M  # (W, W + n_fill)


@lru_cache(maxsize=None)
def _build_blocked_matrix(w, n_fill, g):
    """Block-diagonal kron(I_g, M): (g*W, g*(W+n_fill)), f32."""
    M = _build_interp_matrix(w, n_fill)
    if g == 1:
        return M
    return jnp.kron(jnp.eye(g, dtype=jnp.float32), M)


def _choose_group(w, w_out):
    """Smallest row-group g making both g*W and g*W_out multiples of 128
    (lane-dense loads AND unmasked stores), capped so the block matrix stays
    small.  Falls back to input-dense-only if full density needs a huge g."""
    g_in = 128 // math.gcd(w, 128)
    g_out = 128 // math.gcd(w_out, 128)
    g = (g_in * g_out) // math.gcd(g_in, g_out)  # lcm
    if g * w <= 1024:
        return g
    return g_in if g_in * w <= 1024 else 1


def _choose_row_tile(rg, row_bytes, fixed_bytes, budget=12 * 1024 * 1024):
    """Grouped-row tile: multiple of 8, divides rg, as large as the VMEM budget
    allows (double-buffered), preferring >=2 grid tiles for v7x megacore."""
    if rg <= 8:
        return rg
    best = None
    for tr in (1024, 512, 256, 128, 64, 32, 16, 8):
        if tr > rg or rg % tr != 0:
            continue
        if tr > 8 and 2 * tr * row_bytes + fixed_bytes > budget:
            continue
        if rg // tr >= 2:
            return tr
        if best is None:
            best = tr
    return best if best is not None else rg


# ----------------------------------------------------------------------------
# Wrapper.
# ----------------------------------------------------------------------------
def fft_interpolate_v2(x, n_fill):
    assert n_fill > 0 and n_fill % 2 == 0
    assert x.ndim >= 3  # fft_dim == 3 path of the reference module
    *lead, W = x.shape
    W_out = W + n_fill

    R = 1
    for d in lead:
        R *= d

    g = _choose_group(W, W_out)
    M_blk = _build_blocked_matrix(W, n_fill, g)
    Kb, Nb = M_blk.shape  # (g*W, g*W_out)

    # Group rows into the lane dimension: (R, W) -> (Rg, g*W).  Row-major
    # contiguous, so this reshape is free; pad only if R % g != 0.
    Rg = -(-R // g)
    R_pad = Rg * g
    x2 = x.reshape(R, W)
    if R_pad != R:
        x2 = jnp.pad(x2, ((0, R_pad - R), (0, 0)))
    xg = x2.reshape(Rg, Kb)

    itemsize = jnp.dtype(x.dtype).itemsize
    tr = _choose_row_tile(
        Rg,
        row_bytes=(Kb * itemsize + Nb * itemsize),
        fixed_bytes=2 * Kb * Nb * 4,  # M_blk, double-buffered, f32
    )
    n_tiles = Rg // tr

    flops = 2 * Rg * Kb * Nb
    bytes_accessed = Rg * (Kb + Nb) * itemsize + Kb * Nb * 4

    out = pl.pallas_call(
        _interp_matmul_kernel,
        out_shape=jax.ShapeDtypeStruct((Rg, Nb), x.dtype),
        grid_spec=pltpu.PrefetchScalarGridSpec(
            num_scalar_prefetch=0,
            grid=(n_tiles,),
            in_specs=[
                pl.BlockSpec((tr, Kb), lambda i: (i, 0)),
                pl.BlockSpec((Kb, Nb), lambda i: (0, 0)),
            ],
            out_specs=pl.BlockSpec((tr, Nb), lambda i: (i, 0)),
        ),
        compiler_params=pltpu.CompilerParams(
            dimension_semantics=("parallel",),
        ),
        cost_estimate=pl.CostEstimate(
            flops=flops, transcendentals=0, bytes_accessed=bytes_accessed
        ),
    )(xg, M_blk)

    out = out.reshape(R_pad, W_out)
    if R_pad != R:
        out = out[:R]
    return out.reshape(*lead, W_out)


# ----------------------------------------------------------------------------
# Pure-jnp reference (transcription of the PyTorch forward, 3-D fftn path).
# ----------------------------------------------------------------------------
def _reference_fft_interpolate_v2(x, n_fill):
    drop = n_fill // 2
    dims = (-3, -2, -1)
    xhat = jnp.fft.fftshift(jnp.fft.fftn(x, axes=dims), axes=dims)
    pad_cfg = [(0, 0)] * (x.ndim - 1) + [(drop, drop)]
    xhatpad = jnp.pad(xhat, pad_cfg)
    return jnp.real(
        jnp.fft.ifftn(jnp.fft.ifftshift(xhatpad, axes=dims), axes=dims)
    )


if __name__ == "__main__":
    key = jax.random.PRNGKey(0)
    B, C, H, W = 2, 4, 16, 16
    n_fill = 8  # must be positive and even (module assertion)

    x = jax.random.normal(key, (B, C, H, W), dtype=jnp.float32)

    y = fft_interpolate_v2(x, n_fill)
    y = jax.block_until_ready(y)

    assert y.shape == (B, C, H, W + n_fill), y.shape
    assert y.dtype == jnp.float32, y.dtype

    y_ref = _reference_fft_interpolate_v2(x, n_fill)
    max_err = float(jnp.max(jnp.abs(y - y_ref)))
    assert max_err < 5e-3, f"max abs error too large: {max_err}"

    print("KERNEL_OK")
</pallas_src>

<mosaic_0001>
module attributes {stable_mosaic.version = 11 : i64} {
  func.func @_interp_matmul_kernel(%arg0: i32, %arg1: memref<8x256xf32, #tpu.memory_space<vmem>>, %arg2: memref<256x384xf32, #tpu.memory_space<vmem>>, %arg3: memref<8x384xf32, #tpu.memory_space<vmem>>) attributes {dimension_semantics = [#tpu.dimension_semantics<parallel>], iteration_bounds = array<i64: 1>, scalar_prefetch = 0 : i64, scratch_operands = 0 : i64, tpu.core_type = #tpu.core_type<tc>, window_params = [{transform_indices = @transform_0, window_bounds = array<i64: 8, 256>}, {pipeline_mode = #tpu.pipeline_mode<synchronous>, transform_indices = @transform_1, window_bounds = array<i64: 256, 384>}, {transform_indices = @transform_2, window_bounds = array<i64: 8, 384>}]} {
    %c0 = arith.constant 0 : index
    %c0_0 = arith.constant 0 : index
    %0 = vector.load %arg1[%c0, %c0_0] : memref<8x256xf32, #tpu.memory_space<vmem>>, vector<8x256xf32>
    %c0_1 = arith.constant 0 : index
    %c0_2 = arith.constant 0 : index
    %1 = vector.load %arg2[%c0_1, %c0_2] : memref<256x384xf32, #tpu.memory_space<vmem>>, vector<256x384xf32>
    %cst = arith.constant dense<0.000000e+00> : vector<8x384xf32>
    %2 = tpu.matmul %0, %1, %cst {dimension_numbers = #tpu.dot_dimension_numbers<[1], [0], [0], [1], [0, 0, 1, 1], [], []>} : vector<8x256xf32>, vector<256x384xf32>, vector<8x384xf32> -> vector<8x384xf32>
    %c0_3 = arith.constant 0 : index
    %c0_4 = arith.constant 0 : index
    %3 = vector.load %arg3[%c0_3, %c0_4] : memref<8x384xf32, #tpu.memory_space<vmem>>, vector<8x384xf32>
    tpu.vector_store %arg3[%c0_3, %c0_4], %2 {strides = array<i32>} : memref<8x384xf32, #tpu.memory_space<vmem>>, vector<8x384xf32>,
    return
  }
  func.func @transform_0(%arg0: i32) -> (i32, i32) {
    %c0_i32 = arith.constant 0 : i32
    %c0_i32_0 = arith.constant 0 : i32
    return %arg0, %c0_i32 : i32, i32
  }
  func.func @transform_1(%arg0: i32) -> (i32, i32) {
    %c0_i32 = arith.constant 0 : i32
    %c0_i32_0 = arith.constant 0 : i32
    %c0_i32_1 = arith.constant 0 : i32
    return %c0_i32, %c0_i32_0 : i32, i32
  }
  func.func @transform_2(%arg0: i32) -> (i32, i32) {
    %c0_i32 = arith.constant 0 : i32
    %c0_i32_0 = arith.constant 0 : i32
    return %arg0, %c0_i32 : i32, i32
  }
}

</mosaic_0001>

<bundles_post_ra>
// kernel: tpu_custom_call.1
= control target key start
LH: loop header
LB: loop body
LE: loop exit
PB: predicated region body
PF: predicated region fallthrough
CT: control target
= control target key end

     0   :  { %7 = vsyncpa [#allocation3], 0  ;;  %s567_s0 = inlined_call_operand.hbm [shape: f32[8,256], index: 0, kind: input, shape index: {}]   ;;  %s568_s1 = inlined_call_operand.hbm [shape: f32[256,384], index: 1, kind: input, shape index: {}]   ;;  %s569_s2 = inlined_call_operand.hbm [shape: f32[8,384], index: 2, kind: output, shape index: {}]  }
   0x1   :  { %8 = vsyncpa [#allocation6], 0 }
   0x2   :  { %9 = vsyncpa [#allocation4], 0  ;;  %s504_s9 = smov [#allocation2]   ;;  %s505_s11 = smov [#allocation5]  }
   0x3   :  { %s16_s10 = sshll.u32 %s504_s9, 4  ;;  %s25_s12 = sshll.u32 %s505_s11, 4  ;;  %s17_s10 = int_to_ptr.vmem [resolvable:$true] %s16_s10  ;;  %s524_s12 = int_to_ptr.vmem [resolvable:$true] %s25_s12 }
   0x4   :  { %s432_s15 = scalar_lea.hbm %s567_s0, 256 }
   0x5   :  { %p433_p0 = scmp.ne.s32.totalorder %s567_s0, %s432_s15  ;;  %p436_p1 = scmp.lt.u32.totalorder %s432_s15, %s567_s0 }
   0x7   :  { %p438_p2 = pnand %p436_p1, %p433_p0 }
   0x9   :  { %441 = shalt.err (!%p438_p2)
}
   0xa   :  { %s442_s20 = scalar_lea.vmem %s17_s10, 256  ;;  %p447_p4 = scmp.lt.s32.totalorder %s17_s10, %s17_s10 }
   0xb   :  { %p443_p3 = scmp.ne.s32.totalorder %s17_s10, %s442_s20  ;;  %p448_p5 = scmp.lt.s32.totalorder %s442_s20, %s442_s20 }
   0xd   :  { %p449_p6 = por %p448_p5, %p447_p4 }
   0xf   :  { %p450_p7 = pnand %p449_p6, %p443_p3 }
  0x11   :  { %453 = shalt.err (!%p450_p7)
}
  0x12   :  { %19 = dma.hbm_to_vmem [thread:$0]  %s567_s0, 256, %s17_s10, [#allocation3]  }
  0x13   :  { %s454_s25 = scalar_lea.hbm %s568_s1, 12288 }
  0x14   :  { %p455_p8 = scmp.ne.s32.totalorder %s568_s1, %s454_s25  ;;  %p458_p9 = scmp.lt.u32.totalorder %s454_s25, %s568_s1 }
  0x16   :  { %p460_p10 = pnand %p458_p9, %p455_p8 }
  0x18   :  { %463 = shalt.err (!%p460_p10)
}
  0x19   :  { %s464_s30 = scalar_lea.vmem %s524_s12, 12288  ;;  %p469_p12 = scmp.lt.s32.totalorder %s524_s12, %s524_s12 }
  0x1a   :  { %p465_p11 = scmp.ne.s32.totalorder %s524_s12, %s464_s30  ;;  %p470_p13 = scmp.lt.s32.totalorder %s464_s30, %s464_s30 }
  0x1c   :  { %p471_p0 = por %p470_p13, %p469_p12 }
  0x1e   :  { %p472_p1 = pnand %p471_p0, %p465_p11 }
  0x20   :  { %475 = shalt.err (!%p472_p1)
}
  0x21   :  { %s506_s0 = smov 384   ;;  %s507_s3 = smov 24  }
  0x22   :  { %31 = dma.hbm_to_vmem [thread:$0]  %s568_s1, 12288, %s524_s12, [#allocation6], %s506_s0, %s506_s0, %s507_s3  }
  0x23   :  { %498 = dma.done.wait [#allocation3], 256  }
  0x24   :  { %499 = vsyncadd [#allocation3], 4294967040 }
  0x25   :  { %500 = dma.done.wait [#allocation6], 12288  }
  0x26   :  { %501 = vsyncadd [#allocation6], 4294955008  ;;  %v41_v0 = vld [vmem:[#allocation5 + $0x8] sm:$0xff]  ;;  %v44_v1 = vld [vmem:[#allocation5 + $0x20] sm:$0xff]  ;;  %s508_s1 = smov [#allocation7]  }
  0x27   :  { %v40_v2 = vld [vmem:[#allocation5] sm:$0xff]  ;;  %v331_v3 = vpack.c.bf16 %v44_v1, %v41_v0  ;;  %v43_v4 = vld [vmem:[#allocation5 + $0x18] sm:$0xff]  ;;  %v50_v6 = vld [vmem:[#allocation5 + $0x50] sm:$0xff]  ;;  %s286_s6 = sshll.u32 %s508_s1, 4  ;;  %s287_s6 = int_to_ptr.vmem [resolvable:$true] %s286_s6 }
  0x28   :  { %v47_v5 = vld [vmem:[#allocation5 + $0x38] sm:$0xff]  ;;  %v333_v7 = vpack.c.bf16 %v43_v4, %v40_v2  ;;  %v46_v9 = vld [vmem:[#allocation5 + $0x30] sm:$0xff]  ;;  %v49_v10 = vld [vmem:[#allocation5 + $0x48] sm:$0xff]  ;;  %s476_s7 = scalar_lea.vmem %s287_s6, 384  ;;  %p481_p3 = scmp.lt.s32.totalorder %s287_s6, %s287_s6 }
  0x29   :  { %v335_v8 = vpack.c.bf16 %v50_v6, %v47_v5  ;;  %v53_v11 = vld [vmem:[#allocation5 + $0x68] sm:$0xff]  ;;  %332 = vmatprep.subr.bf16.mxu0 %v331_v3  ;;  %v56_v12 = vld [vmem:[#allocation5 + $0x80] sm:$0xff]  ;;  %v337_v13 = vpack.c.bf16 %v49_v10, %v46_v9  ;;  %v55_v16 = vld [vmem:[#allocation5 + $0x78] sm:$0xff]  ;;  %p477_p2 = scmp.ne.s32.totalorder %s287_s6, %s476_s7  ;;  %p482_p4 = scmp.lt.s32.totalorder %s476_s7, %s476_s7 }
  0x2a   :  { %334 = vmatpush1.bf16.msra.mxu0 %v333_v7  ;;  %v339_v14 = vpack.c.bf16 %v56_v12, %v53_v11  ;;  %v52_v15 = vld [vmem:[#allocation5 + $0x60] sm:$0xff]  ;;  %v59_v17 = vld [vmem:[#allocation5 + $0x98] sm:$0xff]  ;;  %v62_v18 = vld [vmem:[#allocation5 + $0xb0] sm:$0xff] }
  0x2b   :  { %336 = vmatprep.subr.bf16.mxu0 %v335_v8  ;;  %v341_v19 = vpack.c.bf16 %v55_v16, %v52_v15  ;;  %v343_v20 = vpack.c.bf16 %v62_v18, %v59_v17  ;;  %v58_v21 = vld [vmem:[#allocation5 + $0x90] sm:$0xff]  ;;  %v61_v22 = vld [vmem:[#allocation5 + $0xa8] sm:$0xff]  ;;  %v68_v24 = vld [vmem:[#allocation5 + $0xe0] sm:$0xff]  ;;  %p483_p5 = por %p482_p4, %p481_p3 }
  0x2c   :  { %v65_v23 = vld [vmem:[#allocation5 + $0xc8] sm:$0xff]  ;;  %v90_v25 = vld [vmem:[#allocation5 + $0x190] sm:$0xff]  ;;  %v345_v29 = vpack.c.bf16 %v61_v22, %v58_v21  ;;  %v64_v30 = vld [vmem:[#allocation5 + $0xc0] sm:$0xff] }
  0x2d   :  { %v93_v26 = vld [vmem:[#allocation5 + $0x1a8] sm:$0xff]  ;;  %v42_v27 = vld [vmem:[#allocation5 + $0x10] sm:$0xff]  ;;  %v67_v31 = vld [vmem:[#allocation5 + $0xd8] sm:$0xff]  ;;  %v347_v34 = vpack.c.bf16 %v68_v24, %v65_v23  ;;  %p484_p6 = pnand %p483_p5, %p477_p2 }
  0x2e   :  { %338 = vmatpush1.bf16.msra.mxu0 %v337_v13  ;;  %v45_v28 = vld [vmem:[#allocation5 + $0x28] sm:$0xff]  ;;  %v395_v32 = vpack.c.bf16 %v93_v26, %v90_v25  ;;  %v71_v35 = vld [vmem:[#allocation5 + $0xf8] sm:$0xff]  ;;  %v96_v36 = vld [vmem:[#allocation5 + $0x1c0] sm:$0xff]  ;;  %v349_v43 = vpack.c.bf16 %v67_v31, %v64_v30 }
  0x2f   :  { %340 = vmatprep.subr.bf16.mxu0 %v339_v14  ;;  %v397_v33 = vpack.c.bf16 %v45_v28, %v42_v27  ;;  %v99_v37 = vld [vmem:[#allocation5 + $0x1d8] sm:$0xff]  ;;  %v74_v38 = vld [vmem:[#allocation5 + $0x110] sm:$0xff]  ;;  %v48_v40 = vld [vmem:[#allocation5 + $0x40] sm:$0xff] }
  0x30   :  { %396 = vmatprep.subr.bf16.mxu1 %v395_v32  ;;  %v399_v39 = vpack.c.bf16 %v99_v37, %v96_v36  ;;  %v51_v41 = vld [vmem:[#allocation5 + $0x58] sm:$0xff]  ;;  %v102_v44 = vld [vmem:[#allocation5 + $0x1f0] sm:$0xff]  ;;  %v105_v45 = vld [vmem:[#allocation5 + $0x208] sm:$0xff]  ;;  %v351_v47 = vpack.c.bf16 %v74_v38, %v71_v35 }
  0x31   :  { %398 = vmatpush3.bf16.msra.mxu1 %v397_v33  ;;  %v401_v42 = vpack.c.bf16 %v51_v41, %v48_v40  ;;  %v54_v46 = vld [vmem:[#allocation5 + $0x70] sm:$0xff]  ;;  %v73_v49 = vld [vmem:[#allocation5 + $0x108] sm:$0xff]  ;;  %v403_v50 = vpack.c.bf16 %v105_v45, %v102_v44  ;;  %v80_v53 = vld [vmem:[#allocation5 + $0x140] sm:$0xff] }
  0x32   :  { %342 = vmatpush1.bf16.msra.mxu0 %v341_v19  ;;  %400 = vmatprep.subr.bf16.mxu1 %v399_v39  ;;  %v70_v48 = vld [vmem:[#allocation5 + $0xf0] sm:$0xff]  ;;  %v57_v51 = vld [vmem:[#allocation5 + $0x88] sm:$0xff]  ;;  %v108_v54 = vld [vmem:[#allocation5 + $0x220] sm:$0xff] }
  0x33   :  { %344 = vmatprep.subr.bf16.mxu0 %v343_v20  ;;  %v77_v52 = vld [vmem:[#allocation5 + $0x128] sm:$0xff]  ;;  %v405_v55 = vpack.c.bf16 %v57_v51, %v54_v46  ;;  %v111_v56 = vld [vmem:[#allocation5 + $0x238] sm:$0xff]  ;;  %v353_v57 = vpack.c.bf16 %v73_v49, %v70_v48  ;;  %v76_v58 = vld [vmem:[#allocation5 + $0x120] sm:$0xff] }
  0x34   :  { %v407_v59 = vpack.c.bf16 %v111_v56, %v108_v54  ;;  %v60_v60 = vld [vmem:[#allocation5 + $0xa0] sm:$0xff]  ;;  %v63_v61 = vld [vmem:[#allocation5 + $0xb8] sm:$0xff]  ;;  %v355_v62 = vpack.c.bf16 %v80_v53, %v77_v52  ;;  %v114_v0 = vld [vmem:[#allocation5 + $0x250] sm:$0xff] }
  0x35   :  { %402 = vmatpush3.bf16.msra.mxu1 %v401_v42  ;;  %v79_v63 = vld [vmem:[#allocation5 + $0x138] sm:$0xff]  ;;  %v117_v1 = vld [vmem:[#allocation5 + $0x268] sm:$0xff]  ;;  %v86_v3 = vld [vmem:[#allocation5 + $0x170] sm:$0xff]  ;;  %v409_v4 = vpack.c.bf16 %v63_v61, %v60_v60 }
  0x36   :  { %346 = vmatpush1.bf16.msra.mxu0 %v345_v29  ;;  %404 = vmatprep.subr.bf16.mxu1 %v403_v50  ;;  %v83_v2 = vld [vmem:[#allocation5 + $0x158] sm:$0xff]  ;;  %v357_v5 = vpack.c.bf16 %v79_v63, %v76_v58  ;;  %v82_v6 = vld [vmem:[#allocation5 + $0x150] sm:$0xff]  ;;  %v411_v7 = vpack.c.bf16 %v117_v1, %v114_v0  ;;  %v69_v9 = vld [vmem:[#allocation5 + $0xe8] sm:$0xff] }
  0x37   :  { %348 = vmatprep.subr.bf16.mxu0 %v347_v34  ;;  %v66_v8 = vld [vmem:[#allocation5 + $0xd0] sm:$0xff]  ;;  %v359_v10 = vpack.c.bf16 %v86_v3, %v83_v2  ;;  %v85_v11 = vld [vmem:[#allocation5 + $0x168] sm:$0xff]  ;;  %v120_v12 = vld [vmem:[#allocation5 + $0x280] sm:$0xff] }
  0x38   :  { %v123_v13 = vld [vmem:[#allocation5 + $0x298] sm:$0xff]  ;;  %v89_v14 = vld [vmem:[#allocation5 + $0x188] sm:$0xff]  ;;  %v92_v15 = vld [vmem:[#allocation5 + $0x1a0] sm:$0xff]  ;;  %v413_v16 = vpack.c.bf16 %v69_v9, %v66_v8  ;;  %v361_v17 = vpack.c.bf16 %v85_v11, %v82_v6 }
  0x39   :  { %406 = vmatpush3.bf16.msra.mxu1 %v405_v55  ;;  %v88_v18 = vld [vmem:[#allocation5 + $0x180] sm:$0xff]  ;;  %v415_v19 = vpack.c.bf16 %v123_v13, %v120_v12  ;;  %v75_v21 = vld [vmem:[#allocation5 + $0x118] sm:$0xff]  ;;  %v363_v22 = vpack.c.bf16 %v92_v15, %v89_v14  ;;  %v126_v24 = vld [vmem:[#allocation5 + $0x2b0] sm:$0xff] }
  0x3a   :  { %350 = vmatpush1.bf16.msra.mxu0 %v349_v43  ;;  %408 = vmatprep.subr.bf16.mxu1 %v407_v59  ;;  %v72_v20 = vld [vmem:[#allocation5 + $0x100] sm:$0xff]  ;;  %v91_v23 = vld [vmem:[#allocation5 + $0x198] sm:$0xff]  ;;  %v129_v25 = vld [vmem:[#allocation5 + $0x2c8] sm:$0xff] }
  0x3b   :  { %352 = vmatprep.subr.bf16.mxu0 %v351_v47  ;;  %v95_v26 = vld [vmem:[#allocation5 + $0x1b8] sm:$0xff]  ;;  %v98_v27 = vld [vmem:[#allocation5 + $0x1d0] sm:$0xff]  ;;  %v417_v28 = vpack.c.bf16 %v75_v21, %v72_v20  ;;  %v365_v30 = vpack.c.bf16 %v91_v23, %v88_v18  ;;  %v419_v32 = vpack.c.bf16 %v129_v25, %v126_v24  ;;  %v81_v34 = vld [vmem:[#allocation5 + $0x148] sm:$0xff] }
  0x3c   :  { %v39_v29 = vld [vmem:[#allocation2 + $0x8] sm:$0xff]  ;;  %v94_v31 = vld [vmem:[#allocation5 + $0x1b0] sm:$0xff]  ;;  %v367_v35 = vpack.c.bf16 %v98_v27, %v95_v26  ;;  %v97_v36 = vld [vmem:[#allocation5 + $0x1c8] sm:$0xff] }
  0x3d   :  { %410 = vmatpush3.bf16.msra.mxu1 %v409_v4  ;;  %v78_v33 = vld [vmem:[#allocation5 + $0x130] sm:$0xff]  ;;  %v132_v37 = vld [vmem:[#allocation5 + $0x2e0] sm:$0xff]  ;;  %v135_v38 = vld [vmem:[#allocation5 + $0x2f8] sm:$0xff]  ;;  %271 = vmatprep.mubr.f32.mxu1 %v39_v29  ;;  %v369_v42 = vpack.c.bf16 %v97_v36, %v94_v31 }
  0x3e   :  { %354 = vmatpush1.bf16.msra.mxu0 %v353_v57  ;;  %412 = vmatprep.subr.bf16.mxu1 %v411_v7  ;;  %v101_v39 = vld [vmem:[#allocation5 + $0x1e8] sm:$0xff]  ;;  %v104_v40 = vld [vmem:[#allocation5 + $0x200] sm:$0xff]  ;;  %v421_v41 = vpack.c.bf16 %v81_v34, %v78_v33  ;;  %v423_v43 = vpack.c.bf16 %v135_v38, %v132_v37  ;;  %v87_v45 = vld [vmem:[#allocation5 + $0x178] sm:$0xff] }
  0x3f   :  { %356 = vmatprep.subr.bf16.mxu0 %v355_v62  ;;  %200 = vmatprep.mubr.f32.mxu0 %v39_v29  ;;  %v84_v44 = vld [vmem:[#allocation5 + $0x160] sm:$0xff]  ;;  %v371_v46 = vpack.c.bf16 %v104_v40, %v101_v39  ;;  %v103_v48 = vld [vmem:[#allocation5 + $0x1f8] sm:$0xff]  ;;  %v110_v50 = vld [vmem:[#allocation5 + $0x230] sm:$0xff] }
  0x40   :  { %v100_v47 = vld [vmem:[#allocation5 + $0x1e0] sm:$0xff]  ;;  %v107_v49 = vld [vmem:[#allocation5 + $0x218] sm:$0xff]  ;;  %v425_v51 = vpack.c.bf16 %v87_v45, %v84_v44  ;;  %v106_v54 = vld [vmem:[#allocation5 + $0x210] sm:$0xff] }
  0x41   :  { %414 = vmatpush3.bf16.msra.mxu1 %v413_v16  ;;  %v373_v52 = vpack.c.bf16 %v103_v48, %v100_v47  ;;  %v375_v53 = vpack.c.bf16 %v110_v50, %v107_v49  ;;  %v109_v55 = vld [vmem:[#allocation5 + $0x228] sm:$0xff]  ;;  %v116_v57 = vld [vmem:[#allocation5 + $0x260] sm:$0xff]  ;;  %v38_v58 = vld [vmem:[#allocation2] sm:$0xff] }
  0x42   :  { %358 = vmatpush1.bf16.msra.mxu0 %v357_v5  ;;  %416 = vmatprep.subr.bf16.mxu1 %v415_v19  ;;  %v113_v56 = vld [vmem:[#allocation5 + $0x248] sm:$0xff]  ;;  %v377_v59 = vpack.c.bf16 %v109_v55, %v106_v54  ;;  %v112_v61 = vld [vmem:[#allocation5 + $0x240] sm:$0xff]  ;;  %v115_v62 = vld [vmem:[#allocation5 + $0x258] sm:$0xff] }
  0x43   :  { %360 = vmatprep.subr.bf16.mxu0 %v359_v10  ;;  %v379_v60 = vpack.c.bf16 %v116_v57, %v113_v56  ;;  %v119_v63 = vld [vmem:[#allocation5 + $0x278] sm:$0xff]  ;;  %v122_v0 = vld [vmem:[#allocation5 + $0x290] sm:$0xff]  ;;  %v381_v1 = vpack.c.bf16 %v115_v62, %v112_v61  ;;  %v121_v4 = vld [vmem:[#allocation5 + $0x288] sm:$0xff] }
  0x44   :  { %v383_v2 = vpack.c.bf16 %v122_v0, %v119_v63  ;;  %v118_v3 = vld [vmem:[#allocation5 + $0x270] sm:$0xff]  ;;  %v125_v5 = vld [vmem:[#allocation5 + $0x2a8] sm:$0xff]  ;;  %v128_v6 = vld [vmem:[#allocation5 + $0x2c0] sm:$0xff] }
  0x45   :  { %418 = vmatpush3.bf16.msra.mxu1 %v417_v28  ;;  %v385_v7 = vpack.c.bf16 %v121_v4, %v118_v3  ;;  %v387_v8 = vpack.c.bf16 %v128_v6, %v125_v5  ;;  %v124_v9 = vld [vmem:[#allocation5 + $0x2a0] sm:$0xff]  ;;  %v127_v10 = vld [vmem:[#allocation5 + $0x2b8] sm:$0xff]  ;;  %v134_v12 = vld [vmem:[#allocation5 + $0x2f0] sm:$0xff] }
  0x46   :  { %362 = vmatpush1.bf16.msra.mxu0 %v361_v17  ;;  %420 = vmatprep.subr.bf16.mxu1 %v419_v32  ;;  %v131_v11 = vld [vmem:[#allocation5 + $0x2d8] sm:$0xff]  ;;  %v389_v13 = vpack.c.bf16 %v127_v10, %v124_v9  ;;  %v130_v15 = vld [vmem:[#allocation5 + $0x2d0] sm:$0xff]  ;;  %v133_v16 = vld [vmem:[#allocation5 + $0x2e8] sm:$0xff] }
  0x47   :  { %364 = vmatprep.subr.bf16.mxu0 %v363_v22  ;;  %v391_v14 = vpack.c.bf16 %v134_v12, %v131_v11  ;;  %v393_v17 = vpack.c.bf16 %v133_v16, %v130_v15 }
  0x49   :  { %422 = vmatpush3.bf16.msra.mxu1 %v421_v41 }
  0x4a   :  { %366 = vmatpush1.bf16.msra.mxu0 %v365_v30  ;;  %424 = vmatprep.subr.bf16.mxu1 %v423_v43 }
  0x4b   :  { %368 = vmatprep.subr.bf16.mxu0 %v367_v35 }
  0x4d   :  { %426 = vmatpush3.bf16.msra.mxu1 %v425_v51 }
  0x4e   :  { %370 = vmatpush1.bf16.msra.mxu0 %v369_v42 }
  0x4f   :  { %372 = vmatprep.subr.bf16.mxu0 %v371_v46 }
  0x50   :  { %272 = vmatmul.mubr.f32.vlgmr.msra.gmra.mrb[0].mxu1 %v38_v58 }
  0x52   :  { %374 = vmatpush1.bf16.msra.mxu0 %v373_v52 }
  0x53   :  { %376 = vmatprep.subr.bf16.mxu0 %v375_v53 }
  0x56   :  { %378 = vmatpush1.bf16.msra.mxu0 %v377_v59 }
  0x57   :  { %380 = vmatprep.subr.bf16.mxu0 %v379_v60 }
  0x5a   :  { %382 = vmatpush1.bf16.msra.mxu0 %v381_v1 }
  0x5b   :  { %384 = vmatprep.subr.bf16.mxu0 %v383_v2 }
  0x5e   :  { %386 = vmatpush1.bf16.msra.mxu0 %v385_v7 }
  0x5f   :  { %388 = vmatprep.subr.bf16.mxu0 %v387_v8 }
  0x62   :  { %390 = vmatpush1.bf16.msra.mxu0 %v389_v13 }
  0x63   :  { %392 = vmatprep.subr.bf16.mxu0 %v391_v14 }
  0x66   :  { %394 = vmatpush1.bf16.msra.mxu0 %v393_v17 }
  0x69   :  { %201 = vmatmul.mubr.f32.vlgmr.msra.gmra.mrb[0].mxu0 %v38_v58 }
 0x123   :  { %v328_v18 = vpop.f32.mrb[0].mxu1 }
 0x124   :  { %v329_v19 = vpop.f32.mrb[1].mxu1 }
 0x125   :  { %v330_v20 = vadd.f32 %v329_v19, %v328_v18 }
 0x127   :  { %279 = vst [vmem:[#allocation7 + $0x10] sm:$0xff] %v330_v20 }
 0x13c   :  { %v202_v21 = vpop.f32.mrb[0].mxu0 }
 0x13d   :  { %277 = vst [vmem:[#allocation7] sm:$0xff] %v202_v21  ;;  %v204_v22 = vpop.f32.mrb[1].mxu0 }
 0x13e   :  { %278 = vst [vmem:[#allocation7 + $0x8] sm:$0xff] %v204_v22 }
 0x13f   :  { %487 = shalt.err (!%p484_p6)
}
 0x140   :  { %s488_s10 = scalar_lea.hbm %s569_s2, 384 }
 0x141   :  { %p489_p7 = scmp.ne.s32.totalorder %s569_s2, %s488_s10  ;;  %p492_p8 = scmp.lt.u32.totalorder %s488_s10, %s569_s2 }
 0x143   :  { %p494_p9 = pnand %p492_p8, %p489_p7 }
 0x145   :  { %497 = shalt.err (!%p494_p9)
}
 0x146   :  { %289 = dma.vmem_to_hbm [thread:$0]  %s287_s6, 384, %s569_s2, [#allocation4]  }
 0x147   :  { %502 = dma.done.wait [#allocation4], 384  }
 0x148   :  { %503 = vsyncadd [#allocation4], 4294966912 }
 0x149   :  { %293 = vsyncpa [#allocation3], 1 }
 0x14a   :  { %294 = vsyncpa [#allocation6], 1 }
 0x14b   :  { %295 = vsyncpa [#allocation4], 1 }

</bundles_post_ra>
